<compile_context>
chip_gen: v6e
topology: v6e:2x2x1
jax: 0.10.0
libtpu: 0.0.40
codegen_flags: <defaults>
</compile_context>

<pallas_src>
import functools

import jax
import jax.numpy as jnp
import numpy as np
from jax.experimental import pallas as pl
from jax.experimental.pallas import tpu as pltpu


def _mlp_kernel(x_ref, w0_ref, wh_ref, b_ref, wout_ref, bout_ref, o_ref, *, depth):
    """Fused MLP forward on one batch tile (batch on the lane axis).

    Shapes (per grid step):
      x_ref    : (d, TB)                  input tile, transposed
      w0_ref   : (h, d)                   first layer weight (out, in)
      wh_ref   : (max(depth-1,1), h, h)   stacked hidden weights (out, in)
      b_ref    : (depth, h, 1)            stacked hidden biases
      wout_ref : (1, h)                   final layer weight
      bout_ref : (1, 1)                   final layer bias
      o_ref    : (1, TB)                  lane-dense output row
    """
    # Layer 0: (h, d) @ (d, TB) -> (h, TB)
    h = jnp.dot(w0_ref[...], x_ref[...], preferred_element_type=jnp.float32)
    h = jnp.maximum(h + b_ref[0], 0.0)

    # Hidden layers 1..depth-1 (fully unrolled; depth is a Python int).
    for layer_idx in range(1, depth):
        h = jnp.dot(wh_ref[layer_idx - 1], h,
                    preferred_element_type=jnp.float32) + b_ref[layer_idx]
        h = jnp.maximum(h, 0.0)

    # Final projection: (1, h) @ (h, TB) -> (1, TB)  (lane-dense, full-width N)
    o_ref[...] = (jnp.dot(wout_ref[...], h, preferred_element_type=jnp.float32)
                  + bout_ref[...])


def _pick_tile_b(B):
    """Largest lane-aligned batch tile, preferring >=2 grid steps (v7x megacore)."""
    for cand in (4096, 2048, 1024, 512, 256, 128):
        if B % cand == 0 and B // cand >= 2:
            return cand
    for cand in (4096, 2048, 1024, 512, 256, 128):
        if B % cand == 0:
            return cand
    return B  # single full-extent tile (still a legal BlockSpec)


def _pack_params(params):
    """Repack (W (in,out), b (1,out)) params into the transposed, stacked layout."""
    depth = len(params) - 1
    W0, _ = params[0]
    hidden = W0.shape[1]
    dtype = W0.dtype

    w0_t = W0.T  # (h, d)
    if depth > 1:
        wh = jnp.stack([params[l][0].T for l in range(1, depth)], axis=0)  # (D-1, h, h)
    else:
        wh = jnp.zeros((1, hidden, hidden), dtype=dtype)  # dummy, never read
    b_all = jnp.stack([params[l][1].reshape(hidden, 1) for l in range(depth)],
                      axis=0)  # (depth, h, 1)

    W_out, b_out = params[-1]
    wout = W_out.T.reshape(1, hidden)  # (1, h)
    bout = b_out.reshape(1, 1)         # (1, 1)
    return w0_t, wh, b_all, wout, bout


def deepnn_forward(x, params, *, tile_b=None):
    """x: (B, d) float32; params: list of (W (in,out), b (1,out)). Returns (B,)."""
    B, d = x.shape
    depth = len(params) - 1
    assert depth >= 1

    # Pad batch to a lane multiple so every tile store is full-width.
    B_pad = max(128, ((B + 127) // 128) * 128)
    if B_pad != B:
        x = jnp.pad(x, ((0, B_pad - B), (0, 0)))

    if tile_b is None:
        tile_b = _pick_tile_b(B_pad)
    assert B_pad % tile_b == 0, "padded batch must be divisible by tile_b"

    w0_t, wh, b_all, wout, bout = _pack_params(params)
    x_t = x.T  # (d, B_pad): batch on the lane axis

    in_specs = [
        pl.BlockSpec((d, tile_b), lambda i: (0, i)),       # x tile
        pl.BlockSpec(w0_t.shape, lambda i: (0, 0)),        # (h, d)       resident
        pl.BlockSpec(wh.shape, lambda i: (0, 0, 0)),       # (D-1, h, h)  resident
        pl.BlockSpec(b_all.shape, lambda i: (0, 0, 0)),    # (D, h, 1)    resident
        pl.BlockSpec(wout.shape, lambda i: (0, 0)),        # (1, h)       resident
        pl.BlockSpec(bout.shape, lambda i: (0, 0)),        # (1, 1)       resident
    ]

    out = pl.pallas_call(
        functools.partial(_mlp_kernel, depth=depth),
        out_shape=jax.ShapeDtypeStruct((1, B_pad), jnp.float32),
        grid_spec=pltpu.PrefetchScalarGridSpec(
            num_scalar_prefetch=0,
            grid=(B_pad // tile_b,),
            in_specs=in_specs,
            out_specs=pl.BlockSpec((1, tile_b), lambda i: (0, i)),
        ),
        compiler_params=pltpu.CompilerParams(
            dimension_semantics=("parallel",)),
    )(x_t, w0_t, wh, b_all, wout, bout)

    # Matches torch's `.squeeze()` on a (B, 1) output -> (B,); drop any batch pad.
    return jnp.squeeze(out, axis=0)[:B]


def init_deepnn_params(key, d, hidden_size, depth, mode="special"):
    """Deterministic init matching DeepNN.__init__ ('special' mode by default).

    Weights are returned as (in_dim, out_dim); biases as (1, out_dim).
    """
    params = []
    prev_dim = d
    relu_gain = float(np.sqrt(2.0))  # nn.init.calculate_gain('relu')
    for _ in range(depth):
        key, wkey = jax.random.split(key)
        if mode == "special":
            std = relu_gain / np.sqrt(prev_dim)
        else:  # 'mup_pennington' / others: 1/sqrt(fan_in)-style
            std = 1.0 / np.sqrt(prev_dim)
        W = std * jax.random.normal(wkey, (prev_dim, hidden_size), dtype=jnp.float32)
        b = jnp.zeros((1, hidden_size), dtype=jnp.float32)
        params.append((W, b))
        prev_dim = hidden_size

    key, wkey = jax.random.split(key)
    std_out = 0.01 if mode == "special" else 1.0 / np.sqrt(prev_dim)
    W_out = std_out * jax.random.normal(wkey, (prev_dim, 1), dtype=jnp.float32)
    b_out = jnp.zeros((1, 1), dtype=jnp.float32)
    params.append((W_out, b_out))
    return params


def deepnn_forward_ref(x, params):
    """Pure-JAX reference of the same forward pass (for correctness check)."""
    h = x
    for (W, b) in params[:-1]:
        h = jnp.maximum(h @ W + b, 0.0)
    W_out, b_out = params[-1]
    return jnp.squeeze(h @ W_out + b_out, axis=-1)


if __name__ == "__main__":
    # Shapes consistent with the module: x is (batch, d)
    d = 16
    hidden_size = 32
    depth = 3
    batch = 512  # small, but large enough for lane-aligned tiles / 2 grid steps

    key = jax.random.PRNGKey(0)
    key, xkey = jax.random.split(key)
    x = jax.random.normal(xkey, (batch, d), dtype=jnp.float32)

    params = init_deepnn_params(jax.random.PRNGKey(0), d, hidden_size, depth,
                                mode="special")

    y = deepnn_forward(x, params)  # tile_b auto-picked (256 -> 2 grid steps)
    y = jax.block_until_ready(y)

    y_ref = deepnn_forward_ref(x, params)
    np.testing.assert_allclose(np.asarray(y), np.asarray(y_ref),
                               rtol=1e-5, atol=1e-5)
    assert y.shape == (batch,)

    print("KERNEL_OK")
</pallas_src>

<mosaic_0001>
module attributes {stable_mosaic.version = 11 : i64} {
  func.func @_mlp_kernel(%arg0: i32, %arg1: memref<16x256xf32, #tpu.memory_space<vmem>>, %arg2: memref<32x16xf32, #tpu.memory_space<vmem>>, %arg3: memref<2x32x32xf32, #tpu.memory_space<vmem>>, %arg4: memref<3x32x1xf32, #tpu.memory_space<vmem>>, %arg5: memref<1x32xf32, #tpu.memory_space<vmem>>, %arg6: memref<1x1xf32, #tpu.memory_space<vmem>>, %arg7: memref<1x256xf32, #tpu.memory_space<vmem>>) attributes {dimension_semantics = [#tpu.dimension_semantics<parallel>], iteration_bounds = array<i64: 2>, scalar_prefetch = 0 : i64, scratch_operands = 0 : i64, tpu.core_type = #tpu.core_type<tc>, window_params = [{transform_indices = @transform_0, window_bounds = array<i64: 16, 256>}, {pipeline_mode = #tpu.pipeline_mode<synchronous>, transform_indices = @transform_1, window_bounds = array<i64: 32, 16>}, {pipeline_mode = #tpu.pipeline_mode<synchronous>, transform_indices = @transform_2, window_bounds = array<i64: 2, 32, 32>}, {pipeline_mode = #tpu.pipeline_mode<synchronous>, transform_indices = @transform_3, window_bounds = array<i64: 3, 32, 1>}, {pipeline_mode = #tpu.pipeline_mode<synchronous>, transform_indices = @transform_4, window_bounds = array<i64: 1, 32>}, {pipeline_mode = #tpu.pipeline_mode<synchronous>, transform_indices = @transform_5, window_bounds = array<i64: 1, 1>}, {transform_indices = @transform_6, window_bounds = array<i64: 1, 256>}]} {
    %c0 = arith.constant 0 : index
    %c0_0 = arith.constant 0 : index
    %0 = vector.load %arg2[%c0, %c0_0] : memref<32x16xf32, #tpu.memory_space<vmem>>, vector<32x16xf32>
    %c0_1 = arith.constant 0 : index
    %c0_2 = arith.constant 0 : index
    %1 = vector.load %arg1[%c0_1, %c0_2] : memref<16x256xf32, #tpu.memory_space<vmem>>, vector<16x256xf32>
    %cst = arith.constant dense<0.000000e+00> : vector<32x256xf32>
    %2 = tpu.matmul %0, %1, %cst {dimension_numbers = #tpu.dot_dimension_numbers<[1], [0], [0], [1], [0, 0, 1, 1], [], []>} : vector<32x16xf32>, vector<16x256xf32>, vector<32x256xf32> -> vector<32x256xf32>
    %c0_3 = arith.constant 0 : index
    %c0_4 = arith.constant 0 : index
    %c0_5 = arith.constant 0 : index
    %3 = vector.load %arg4[%c0_3, %c0_4, %c0_5] : memref<3x32x1xf32, #tpu.memory_space<vmem>>, vector<1x32x1xf32>
    %4 = vector.shape_cast %3 : vector<1x32x1xf32> to vector<32x1xf32>
    %5 = vector.broadcast %4 : vector<32x1xf32> to vector<32x256xf32>
    %6 = arith.addf %2, %5 : vector<32x256xf32>
    %cst_6 = arith.constant 0.000000e+00 : f32
    %7 = vector.broadcast %cst_6 : f32 to vector<32x256xf32>
    %8 = arith.maximumf %6, %7 : vector<32x256xf32>
    %c0_7 = arith.constant 0 : index
    %c0_8 = arith.constant 0 : index
    %c0_9 = arith.constant 0 : index
    %9 = vector.load %arg3[%c0_7, %c0_8, %c0_9] : memref<2x32x32xf32, #tpu.memory_space<vmem>>, vector<1x32x32xf32>
    %10 = vector.shape_cast %9 : vector<1x32x32xf32> to vector<32x32xf32>
    %cst_10 = arith.constant dense<0.000000e+00> : vector<32x256xf32>
    %11 = tpu.matmul %10, %8, %cst_10 {dimension_numbers = #tpu.dot_dimension_numbers<[1], [0], [0], [1], [0, 0, 1, 1], [], []>} : vector<32x32xf32>, vector<32x256xf32>, vector<32x256xf32> -> vector<32x256xf32>
    %c1 = arith.constant 1 : index
    %c0_11 = arith.constant 0 : index
    %c0_12 = arith.constant 0 : index
    %12 = vector.load %arg4[%c1, %c0_11, %c0_12] : memref<3x32x1xf32, #tpu.memory_space<vmem>>, vector<1x32x1xf32>
    %13 = vector.shape_cast %12 : vector<1x32x1xf32> to vector<32x1xf32>
    %14 = vector.broadcast %13 : vector<32x1xf32> to vector<32x256xf32>
    %15 = arith.addf %11, %14 : vector<32x256xf32>
    %cst_13 = arith.constant 0.000000e+00 : f32
    %16 = vector.broadcast %cst_13 : f32 to vector<32x256xf32>
    %17 = arith.maximumf %15, %16 : vector<32x256xf32>
    %c1_14 = arith.constant 1 : index
    %c0_15 = arith.constant 0 : index
    %c0_16 = arith.constant 0 : index
    %18 = vector.load %arg3[%c1_14, %c0_15, %c0_16] : memref<2x32x32xf32, #tpu.memory_space<vmem>>, vector<1x32x32xf32>
    %19 = vector.shape_cast %18 : vector<1x32x32xf32> to vector<32x32xf32>
    %cst_17 = arith.constant dense<0.000000e+00> : vector<32x256xf32>
    %20 = tpu.matmul %19, %17, %cst_17 {dimension_numbers = #tpu.dot_dimension_numbers<[1], [0], [0], [1], [0, 0, 1, 1], [], []>} : vector<32x32xf32>, vector<32x256xf32>, vector<32x256xf32> -> vector<32x256xf32>
    %c2 = arith.constant 2 : index
    %c0_18 = arith.constant 0 : index
    %c0_19 = arith.constant 0 : index
    %21 = vector.load %arg4[%c2, %c0_18, %c0_19] : memref<3x32x1xf32, #tpu.memory_space<vmem>>, vector<1x32x1xf32>
    %22 = vector.shape_cast %21 : vector<1x32x1xf32> to vector<32x1xf32>
    %23 = vector.broadcast %22 : vector<32x1xf32> to vector<32x256xf32>
    %24 = arith.addf %20, %23 : vector<32x256xf32>
    %cst_20 = arith.constant 0.000000e+00 : f32
    %25 = vector.broadcast %cst_20 : f32 to vector<32x256xf32>
    %26 = arith.maximumf %24, %25 : vector<32x256xf32>
    %c0_21 = arith.constant 0 : index
    %c0_22 = arith.constant 0 : index
    %27 = vector.load %arg5[%c0_21, %c0_22] : memref<1x32xf32, #tpu.memory_space<vmem>>, vector<1x32xf32>
    %cst_23 = arith.constant dense<0.000000e+00> : vector<1x256xf32>
    %28 = tpu.matmul %27, %26, %cst_23 {dimension_numbers = #tpu.dot_dimension_numbers<[1], [0], [0], [1], [0, 0, 1, 1], [], []>} : vector<1x32xf32>, vector<32x256xf32>, vector<1x256xf32> -> vector<1x256xf32>
    %c0_24 = arith.constant 0 : index
    %c0_25 = arith.constant 0 : index
    %29 = vector.load %arg6[%c0_24, %c0_25] : memref<1x1xf32, #tpu.memory_space<vmem>>, vector<1x1xf32>
    %30 = vector.broadcast %29 : vector<1x1xf32> to vector<1x256xf32>
    %31 = arith.addf %28, %30 : vector<1x256xf32>
    %c0_26 = arith.constant 0 : index
    %c0_27 = arith.constant 0 : index
    %32 = vector.load %arg7[%c0_26, %c0_27] : memref<1x256xf32, #tpu.memory_space<vmem>>, vector<1x256xf32>
    tpu.vector_store %arg7[%c0_26, %c0_27], %31 {strides = array<i32>} : memref<1x256xf32, #tpu.memory_space<vmem>>, vector<1x256xf32>,
    return
  }
  func.func @transform_0(%arg0: i32) -> (i32, i32) {
    %c0_i32 = arith.constant 0 : i32
    %c0_i32_0 = arith.constant 0 : i32
    return %c0_i32, %arg0 : i32, i32
  }
  func.func @transform_1(%arg0: i32) -> (i32, i32) {
    %c0_i32 = arith.constant 0 : i32
    %c0_i32_0 = arith.constant 0 : i32
    %c0_i32_1 = arith.constant 0 : i32
    return %c0_i32, %c0_i32_0 : i32, i32
  }
  func.func @transform_2(%arg0: i32) -> (i32, i32, i32) {
    %c0_i32 = arith.constant 0 : i32
    %c0_i32_0 = arith.constant 0 : i32
    %c0_i32_1 = arith.constant 0 : i32
    %c0_i32_2 = arith.constant 0 : i32
    return %c0_i32, %c0_i32_0, %c0_i32_1 : i32, i32, i32
  }
  func.func @transform_3(%arg0: i32) -> (i32, i32, i32) {
    %c0_i32 = arith.constant 0 : i32
    %c0_i32_0 = arith.constant 0 : i32
    %c0_i32_1 = arith.constant 0 : i32
    %c0_i32_2 = arith.constant 0 : i32
    return %c0_i32, %c0_i32_0, %c0_i32_1 : i32, i32, i32
  }
  func.func @transform_4(%arg0: i32) -> (i32, i32) {
    %c0_i32 = arith.constant 0 : i32
    %c0_i32_0 = arith.constant 0 : i32
    %c0_i32_1 = arith.constant 0 : i32
    return %c0_i32, %c0_i32_0 : i32, i32
  }
  func.func @transform_5(%arg0: i32) -> (i32, i32) {
    %c0_i32 = arith.constant 0 : i32
    %c0_i32_0 = arith.constant 0 : i32
    %c0_i32_1 = arith.constant 0 : i32
    return %c0_i32, %c0_i32_0 : i32, i32
  }
  func.func @transform_6(%arg0: i32) -> (i32, i32) {
    %c0_i32 = arith.constant 0 : i32
    %c0_i32_0 = arith.constant 0 : i32
    return %c0_i32, %arg0 : i32, i32
  }
}

</mosaic_0001>

<bundles_post_ra>
// kernel: tpu_custom_call.1
= control target key start
LH: loop header
LB: loop body
LE: loop exit
PB: predicated region body
PF: predicated region fallthrough
CT: control target
= control target key end

     0   :  { %s1279_s0 = inlined_call_operand.vmem [shape: f32[16,512], index: 0, kind: input, shape index: {}]   ;;  %s1280_s1 = inlined_call_operand.vmem [shape: f32[32,16], index: 1, kind: input, shape index: {}]   ;;  %s1281_s2 = inlined_call_operand.vmem [shape: f32[2,32,32], index: 2, kind: input, shape index: {}]   ;;  %s1282_s3 = inlined_call_operand.vmem [shape: f32[3,32,1], index: 3, kind: input, shape index: {}]   ;;  %s1283_s4 = inlined_call_operand.vmem [shape: f32[1,32], index: 4, kind: input, shape index: {}]   ;;  %s1284_s5 = inlined_call_operand.<no memory space> [shape: f32[1,1], index: 5, kind: input, shape index: {}]   ;;  %s1285_s6 = inlined_call_operand.hbm [shape: f32[1,512], index: 6, kind: output, shape index: {}]  }
   0x1   :  { %v11_v0 = vstv %s1284_s5 }
   0x2   :  { %12 = vst [vmem:[#allocation2] sm:$0x1] %v11_v0 }
   0x3   :  { %13 = vsyncpa [#allocation5], 0 }
   0x4   :  { %15 = vsyncpa [#allocation5 + $0x1], 0  ;;  %s1081_s23 = smov 0   ;;  %s1083_s24 = smov 0  }
   0x5   :  { %s1085_s25 = smov 0   ;;  %s1087_s26 = smov 0  }
   0x6 LB: > { %s887_s5 = sadd.s32 4294967295, %s1037_s26   ;;  %s888_s27 = sadd.s32 4294967294, %s1037_s26   ;;  %s1037_s26 = sphi %s1087_s26, %s1293_s26   ;;  %s1033_s25 = sphi %s1085_s25, %s1292_s25   ;;  %s1029_s24 = sphi %s1083_s24, %s1291_s24   ;;  %s1025_s23 = sphi %s1081_s23, %s1290_s23  }
   0x7   : > { %s1104_s28 = sadd.s32 1, %s1037_s26   ;;  %s28_s29 = sadd.s32 1, %s1033_s25 }
   0x8   : > { %s25_s30 = ssub.s32 %s1037_s26, %s1104_s28  ;;  %p35_p0 = scmp.ne.s32.totalorder %s1033_s25, %s1029_s24 }
   0x9   : > { %p26_p1 = scmp.eq.s32.totalorder %s25_s30, 0  ;;  %p36_p2 = scmp.eq.s32.totalorder %s1037_s26, 0 }
   0xa   : > { %p170_p3 = scmp.eq.s32.totalorder %s887_s5, 1  ;;  %p175_p4 = scmp.ne.s32.totalorder %s1029_s24, %s1025_s23 }
   0xb   : > { %s1117_s7 = scalar_select %p26_p1, %s1033_s25, %s28_s29  }
   0xc   : > { %p37_p5 = por %p36_p2, %p35_p0  ;;  %p1119_p6 = por %p170_p3, %p35_p0 }
   0xd   : > { %p176_p7 = scmp.eq.s32.totalorder %s888_s27, 1  ;;  %p1286_p9 = scmp.ge.s32.totalorder %s1037_s26, 2 }
   0xf   : > { %p1123_p8 = por %p176_p7, %p175_p4  ;;  %207 = sbr.rel (%p1286_p9) target bundleno = 26 (0x1a), region = 36 }
  0x14   : > { %210 = sbr.rel (!%p37_p5) target bundleno = 26 (0x1a), region = 40  ;;  %s212_s10 = sand.u32 (%p37_p5), 1, %s1033_s25  }
  0x15   : > { %s927_s11 = sshll.u32 (%p37_p5), %s1037_s26, 4  ;;  %s891_s12 = sshll.u32 (%p37_p5), %s212_s10, 5 }
  0x16   : > { %s217_s15 = scalar_lea.vmem (%p37_p5), %s1279_s0, %s927_s11  ;;  %s214_s16 = scalar_lea.vmem (%p37_p5), [#allocation3], %s891_s12 }
  0x17   : > { %v230_v1 = vld [vmem:[%s217_s15] sm:$0xff] (%p37_p5)  ;;  %v232_v2 = vld [vmem:[%s217_s15 + $0x8] sm:$0xff] (%p37_p5) }
  0x18   : > { %v234_v3 = vld [vmem:[%s217_s15 + $0x20] sm:$0xff] (%p37_p5)  ;;  %231 = vst [vmem:[%s214_s16] sm:$0xff] (%p37_p5), %v230_v1  ;;  %233 = vst [vmem:[%s214_s16 + $0x8] sm:$0xff] (%p37_p5), %v232_v2  ;;  %v236_v4 = vld [vmem:[%s217_s15 + $0x28] sm:$0xff] (%p37_p5) }
  0x19   : > { %235 = vst [vmem:[%s214_s16 + $0x10] sm:$0xff] %v234_v3  ;;  %237 = vst [vmem:[%s214_s16 + $0x18] sm:$0xff] %v236_v4 }
  0x1a PF: > { %p894_p10 = scmp.ge.s32.totalorder %s1037_s26, 1  ;;  %p242_p11 = scmp.lt.s32.totalorder %s1037_s26, 3 }
  0x1c   : > { %p243_p12 = pnand %p894_p10, %p242_p11 }
  0x1d   : > { %s1138_s17 = sand.u32 (!%p243_p12), 1, %s1029_s24   ;;  %s928_s10 = sshll.u32 (!%p243_p12), %s887_s5, 5 }
  0x1e   : > { %246 = sbr.rel (%p243_p12) target bundleno = 908 (0x38c), region = 63  ;;  %s895_s18 = sshll.u32 (!%p243_p12), %s1138_s17, 5 }
  0x1f   : > { %s251_s27 = scalar_lea.vmem (!%p243_p12), [#allocation3], %s895_s18  ;;  %s896_s30 = sshll.u32 (!%p243_p12), %s1138_s17, 1 }
  0x20   : > { %s277_s11 = scalar_lea.vmem (!%p243_p12), [#allocation4], %s896_s30  ;;  %s821_s15 = scalar_lea.hbm (!%p243_p12), %s1285_s6, %s928_s10 }
  0x21   : > { %s823_s12 = sshll.u32 (!%p243_p12), %s277_s11, 4  ;;  %s809_s16 = scalar_lea.sflag (!%p243_p12), [#allocation5], %s1138_s17  ;;  %s824_s12 = int_to_ptr.vmem [resolvable:$true] %s823_s12 }
  0x22   : > { %s977_s18 = scalar_lea.vmem (!%p243_p12), %s824_s12, 32  ;;  %s1042_s19 = smov (!%p243_p12), [#allocation4]  }
  0x23   : > { %v1039_v5 = vmov 0.0   ;;  %v291_v6 = vld [vmem:[%s1282_s3 + $0x18] sm:$0xff]  ;;  %v1040_v7 = vmov 0   ;;  %v289_v8 = vld [vmem:[%s1282_s3 + $0x8] sm:$0xff]  ;;  %v282_v13 = vld [vmem:[%s1280_s1 + $0x10] sm:$0xff]  ;;  %vm312_vm0 = vcmask 130048   ;;  %p978_p13 = scmp.ne.s32.totalorder %s824_s12, %s977_s18 }
  0x24   : > { %401 = vmatprep.mubr.f32.mxu1 %v1039_v5  ;;  %389 = vmatprep.mubr.f32.mxu0 %v1039_v5  ;;  %v287_v9 = vld [vmem:[%s251_s27 + $0x18] sm:$0xff]  ;;  %v286_v10 = vld [vmem:[%s251_s27 + $0x10] sm:$0xff]  ;;  %v285_v11 = vld [vmem:[%s251_s27 + $0x8] sm:$0xff]  ;;  %vm451_vm1 = vcmask 261120   ;;  %s981_s20 = sshll.u32 %s1042_s19, 4  ;;  %s982_s20 = int_to_ptr.vmem [resolvable:$false] %s981_s20 }
  0x25   : > { %975 = vset.pattern.permute.xlu0 %v1040_v7  ;;  %976 = vset.pattern.permute.xlu1 %v1040_v7  ;;  %v284_v12 = vld [vmem:[%s251_s27] sm:$0xff]  ;;  %v290_v15 = vld [vmem:[%s1282_s3 + $0x10] sm:$0xff]  ;;  %v283_v17 = vld [vmem:[%s1280_s1 + $0x18] sm:$0xff]  ;;  %p979_p0 = pnand %p978_p13, %p1119_p6  ;;  %s983_s5 = scalar_lea.vmem %s982_s20, 64 }
  0x26   : > { %309 = vperm.xlu0 %975, %v291_v6   ;;  %299 = vperm.xlu1 %976, %v289_v8   ;;  %v280_v14 = vld [vmem:[%s1280_s1] sm:$0xff]  ;;  %v281_v18 = vld [vmem:[%s1280_s1 + $0x8] sm:$0xff]  ;;  %v904_v19 = vld [vmem:[%s1282_s3 + $0x38] sm:$0xff]  ;;  %p984_p2 = scmp.lt.s32.totalorder %s824_s12, %s982_s20  ;;  %p985_p3 = scmp.lt.s32.totalorder %s983_s5, %s977_s18 }
  0x27   : > { %929 = vmatprep.subr.mxu1 %v287_v9  ;;  %353 = vmatprep.subr.mxu0 %v287_v9  ;;  %v288_v16 = vld [vmem:[%s1282_s3] sm:$0xff]  ;;  %v903_v20 = vld [vmem:[%s1282_s3 + $0x30] sm:$0xff]  ;;  %v902_v21 = vld [vmem:[%s1282_s3 + $0x28] sm:$0xff]  ;;  %p980_p1 = pneg %p979_p0 }
  0x28   : > { %931 = vmatpush1.msra.mxu1 %v286_v10  ;;  %354 = vmatpush1.msra.mxu0 %v286_v10  ;;  %v901_v22 = vld [vmem:[%s1282_s3 + $0x20] sm:$0xff]  ;;  %v916_v23 = vld [vmem:[%s1282_s3 + $0x58] sm:$0xff]  ;;  %v915_v24 = vld [vmem:[%s1282_s3 + $0x50] sm:$0xff]  ;;  %p986_p4 = por %p985_p3, %p984_p2 }
  0x29   : > { %930 = vmatprep.subr.mxu1 %v285_v11  ;;  %355 = vmatprep.subr.mxu0 %v285_v11  ;;  %v914_v25 = vld [vmem:[%s1282_s3 + $0x48] sm:$0xff]  ;;  %v913_v26 = vld [vmem:[%s1282_s3 + $0x40] sm:$0xff]  ;;  %v424_v58 = vld [vmem:[%s1281_s2 + $0x10] sm:$0xff] }
  0x2a   : > { %932 = vmatpush1.msra.mxu1 %v284_v12  ;;  %356 = vmatpush1.msra.mxu0 %v284_v12  ;;  %v701_v27 = vld [vmem:[#allocation2] sm:$0x1]  ;;  %v423_v57 = vld [vmem:[%s1281_s2 + $0x8] sm:$0xff]  ;;  %v425_v59 = vld [vmem:[%s1281_s2 + $0x18] sm:$0xff]  ;;  %p987_p5 = pnand %p986_p4, %p980_p1 }
  0x2b   : > { %899 = vmatmul.mubr.msk.f32.vlgmr.msra.gmra.mxu1 %vm312_vm0, %v282_v13  ;;  %897 = vmatmul.mubr.msk.f32.vlgmr.msra.gmra.mxu0 %vm312_vm0, %v280_v14  ;;  %v422_v56 = vld [vmem:[%s1281_s2] sm:$0xff] }
  0x2c   : > { %407 = vmatprep.mubr.f32.mxu1 %v1039_v5  ;;  %395 = vmatprep.mubr.f32.mxu0 %v1039_v5 }
  0x2d   : > { %304 = vperm.xlu0 %975, %v290_v15   ;;  %294 = vperm.xlu1 %976, %v288_v16  }
  0x2f   : > { %900 = vmatmul.mubr.msk.f32.gmra.mxu1 %vm312_vm0, %v283_v17  ;;  %898 = vmatmul.mubr.msk.f32.gmra.mxu0 %vm312_vm0, %v281_v18 }
  0x30   : > { %528 = vmatprep.mubr.f32.mxu1 %v1039_v5  ;;  %667 = vmatprep.mubr.f32.mxu0 %v1039_v5 }
  0x31   : > { %448 = vperm.xlu0 %975, %v904_v19   ;;  %443 = vperm.xlu1 %976, %v903_v20  }
  0x35   : > { %438 = vperm.xlu0 %975, %v902_v21   ;;  %433 = vperm.xlu1 %976, %v901_v22  }
  0x39   : > { %588 = vperm.xlu0 %975, %v916_v23   ;;  %583 = vperm.xlu1 %976, %v915_v24  }
  0x3d   : > { %578 = vperm.xlu0 %975, %v914_v25   ;;  %573 = vperm.xlu1 %976, %v913_v26   ;;  %v909_v25 = vld [vmem:[%s1281_s2 + $0x20] sm:$0xff]  ;;  %v910_v26 = vld [vmem:[%s1281_s2 + $0x28] sm:$0xff] }
  0x41   : > { %704 = vperm.xlu0 %975, %v701_v27   ;;  %v911_v27 = vld [vmem:[%s1281_s2 + $0x30] sm:$0xff] }
  0xa1   : > { %v310_v28 = vpop.permute.xlu0 %309  ;;  %v300_v33 = vpop.permute.xlu1 %299 }
  0xa8   : > { %v305_v36 = vpop.permute.xlu0 %304  ;;  %v295_v45 = vpop.permute.xlu1 %294 }
  0xac   : > { %v449_v1 = vpop.permute.xlu0 %448  ;;  %v444_v3 = vpop.permute.xlu1 %443 }
  0xb0   : > { %v439_v10 = vpop.permute.xlu0 %438  ;;  %v434_v14 = vpop.permute.xlu1 %433 }
  0xeb   : > { %v403_v29 = vpop.f32.mrf.mxu1  ;;  %v391_v30 = vpop.f32.mrf.mxu0 }
  0xec   : > { %v404_v42 = vadd.f32 %v403_v29, %v305_v36  ;;  %v392_v51 = vadd.f32 %v391_v30, %v295_v45 }
  0xed   : > { %v405_v31 = vpop.f32.mrf.mxu1  ;;  %v393_v32 = vpop.f32.mrf.mxu0 }
  0xee   : > { %v406_v40 = vadd.f32 %v405_v31, %v305_v36  ;;  %v394_v49 = vadd.f32 %v393_v32, %v295_v45  ;;  %v418_v50 = vmax.f32 %v404_v42, 0.0  ;;  %v414_v55 = vmax.f32 %v392_v51, 0.0  ;;  %v584_v36 = vpop.permute.xlu1 %583 }
  0xef   : > { %v409_v34 = vpop.f32.mrf.mxu1  ;;  %v397_v35 = vpop.f32.mrf.mxu0 }
  0xf0   : > { %v410_v37 = vadd.f32 %v409_v34, %v310_v28  ;;  %v398_v47 = vadd.f32 %v397_v35, %v300_v33  ;;  %v419_v48 = vmax.f32 %v406_v40, 0.0  ;;  %v415_v54 = vmax.f32 %v394_v49, 0.0  ;;  %v589_v34 = vpop.permute.xlu0 %588 }
  0xf1   : > { %v411_v38 = vpop.f32.mrf.mxu1  ;;  %v399_v39 = vpop.f32.mrf.mxu0 }
  0xf2   : > { %v412_v41 = vadd.f32 %v411_v38, %v310_v28  ;;  %v400_v44 = vadd.f32 %v399_v39, %v300_v33  ;;  %v420_v46 = vmax.f32 %v410_v37, 0.0  ;;  %v416_v53 = vmax.f32 %v398_v47, 0.0  ;;  %v912_v28 = vld [vmem:[%s1281_s2 + $0x38] sm:$0xff]  ;;  %v574_v45 = vpop.permute.xlu1 %573 }
  0xf4   : > { %v421_v43 = vmax.f32 %v412_v41, 0.0  ;;  %v417_v52 = vmax.f32 %v400_v44, 0.0 }
  0xf6   : > { %488 = vmatprep.subr.mxu1 %v421_v43 }
  0xf7   : > { %489 = vmatpush1.msra.mxu1 %v420_v46 }
  0xf8   : > { %490 = vmatprep.subr.mxu1 %v419_v48 }
  0xf9   : > { %491 = vmatpush1.msra.mxu1 %v418_v50 }
  0xfa   : > { %492 = vmatprep.subr.mxu1 %v417_v52 }
  0xfb   : > { %493 = vmatpush1.msra.mxu1 %v416_v53 }
  0xfc   : > { %494 = vmatprep.subr.mxu1 %v415_v54 }
  0xfd   : > { %495 = vmatpush1.msra.mxu1 %v414_v55 }
  0xfe   : > { %905 = vmatmul.mubr.msk.f32.vlgmr.msra.gmra.mxu1 %vm451_vm1, %v422_v56  ;;  %v700_v56 = vld [vmem:[%s1283_s4] sm:$0x1] }
  0xff   : > { %534 = vmatprep.mubr.f32.mxu1 %v1039_v5 }
 0x102   : > { %906 = vmatmul.mubr.msk.f32.gmra.mxu1 %vm451_vm1, %v423_v57  ;;  %v707_v57 = vlaneseq }
 0x103   : > { %540 = vmatprep.mubr.f32.mxu1 %v1039_v5 }
 0x104   : > { %vm805_vm2 = vcmp.lt.s32.totalorder %v707_v57, 256 }
 0x106   : > { %907 = vmatmul.mubr.msk.f32.gmra.mxu1 %vm451_vm1, %v424_v58  ;;  %v708_v58 = vshrl.u32 %v707_v57, 7 }
 0x107   : > { %546 = vmatprep.mubr.f32.mxu1 %v1039_v5 }
 0x10a   : > { %908 = vmatmul.mubr.msk.f32.gmra.mxu1 %vm451_vm1, %v425_v59  ;;  %v1041_v59 = vmov 1966171168  }
 0x10b   : > { %778 = vmatprep.mubr.f32.mxu1 %v1039_v5 }
 0x1be   : > { %v530_v60 = vpop.f32.mrf.mxu1 }
 0x1bf   : > { %v531_v19 = vadd.f32 %v530_v60, %v434_v14  ;;  %v789_v60 = vunpack.c.l.s4 %v1041_v59 }
 0x1c0   : > { %v532_v61 = vpop.f32.mrf.mxu1 }
 0x1c1   : > { %v533_v17 = vadd.f32 %v532_v61, %v434_v14  ;;  %v553_v24 = vmax.f32 %v531_v19, 0.0  ;;  %v709_v61 = vsub.s32 0, %v708_v58 }
 0x1c2   : > { %v536_v62 = vpop.f32.mrf.mxu1 }
 0x1c3   : > { %v537_v15 = vadd.f32 %v536_v62, %v439_v10  ;;  %v554_v23 = vmax.f32 %v533_v17, 0.0 }
 0x1c4   : > { %v538_v63 = vpop.f32.mrf.mxu1 }
 0x1c5   : > { %v539_v12 = vadd.f32 %v538_v63, %v439_v10  ;;  %v555_v22 = vmax.f32 %v537_v15, 0.0  ;;  %v790_v63 = vunpack.c.0.s8 %v789_v60 }
 0x1c6   : > { %v542_v0 = vpop.f32.mrf.mxu1 }
 0x1c7   : > { %v543_v11 = vadd.f32 %v542_v0, %v444_v3  ;;  %v556_v21 = vmax.f32 %v539_v12, 0.0 }
 0x1c8   : > { %v544_v2 = vpop.f32.mrf.mxu1 }
 0x1c9   : > { %v545_v8 = vadd.f32 %v544_v2, %v444_v3  ;;  %v557_v20 = vmax.f32 %v543_v11, 0.0 }
 0x1ca   : > { %v548_v4 = vpop.f32.mrf.mxu1 }
 0x1cb   : > { %v549_v6 = vadd.f32 %v548_v4, %v449_v1  ;;  %v558_v18 = vmax.f32 %v545_v8, 0.0 }
 0x1cc   : > { %v550_v7 = vpop.f32.mrf.mxu1 }
 0x1cd   : > { %v551_v9 = vadd.f32 %v550_v7, %v449_v1  ;;  %v559_v16 = vmax.f32 %v549_v6, 0.0  ;;  %v793_v6 = vsub.s32 %v790_v63, %v708_v58 }
 0x1cf   : > { %v560_v13 = vmax.f32 %v551_v9, 0.0 }
 0x1d1   : > { %627 = vmatprep.subr.mxu0 %v560_v13 }
 0x1d2   : > { %628 = vmatpush1.msra.mxu0 %v559_v16 }
 0x1d3   : > { %629 = vmatprep.subr.mxu0 %v558_v18 }
 0x1d4   : > { %630 = vmatpush1.msra.mxu0 %v557_v20 }
 0x1d5   : > { %631 = vmatprep.subr.mxu0 %v556_v21 }
 0x1d6   : > { %632 = vmatpush1.msra.mxu0 %v555_v22 }
 0x1d7   : > { %633 = vmatprep.subr.mxu0 %v554_v23 }
 0x1d8   : > { %634 = vmatpush1.msra.mxu0 %v553_v24 }
 0x1d9   : > { %917 = vmatmul.mubr.msk.f32.vlgmr.msra.gmra.mxu0 %vm451_vm1, %v909_v25 }
 0x1da   : > { %673 = vmatprep.mubr.f32.mxu0 %v1039_v5 }
 0x1dd   : > { %918 = vmatmul.mubr.msk.f32.gmra.mxu0 %vm451_vm1, %v910_v26 }
 0x1de   : > { %679 = vmatprep.mubr.f32.mxu0 %v1039_v5 }
 0x1e1   : > { %919 = vmatmul.mubr.msk.f32.gmra.mxu0 %vm451_vm1, %v911_v27 }
 0x1e2   : > { %685 = vmatprep.mubr.f32.mxu0 %v1039_v5  ;;  %v579_v5 = vpop.permute.xlu0 %578 }
 0x1e5   : > { %920 = vmatmul.mubr.msk.f32.gmra.mxu0 %vm451_vm1, %v912_v28 }
 0x1e6   : > { %v705_v62 = vpop.permute.xlu0 %704 }
 0x1e7   : > { %v710_v1 = vrot.slane %v705_v62, %v709_v61 }
 0x299   : > { %v669_v29 = vpop.f32.mrf.mxu0 }
 0x29a   : > { %v670_v50 = vadd.f32 %v669_v29, %v574_v45 }
 0x29b   : > { %v671_v30 = vpop.f32.mrf.mxu0 }
 0x29c   : > { %v672_v48 = vadd.f32 %v671_v30, %v574_v45  ;;  %v692_v55 = vmax.f32 %v670_v50, 0.0 }
 0x29d   : > { %v675_v31 = vpop.f32.mrf.mxu0 }
 0x29e   : > { %v676_v46 = vadd.f32 %v675_v31, %v579_v5  ;;  %v693_v54 = vmax.f32 %v672_v48, 0.0 }
 0x29f   : > { %v677_v32 = vpop.f32.mrf.mxu0 }
 0x2a0   : > { %v678_v43 = vadd.f32 %v677_v32, %v579_v5  ;;  %v694_v53 = vmax.f32 %v676_v46, 0.0 }
 0x2a1   : > { %v681_v33 = vpop.f32.mrf.mxu0 }
 0x2a2   : > { %v682_v42 = vadd.f32 %v681_v33, %v584_v36  ;;  %v695_v52 = vmax.f32 %v678_v43, 0.0 }
 0x2a3   : > { %v683_v35 = vpop.f32.mrf.mxu0 }
 0x2a4   : > { %v684_v40 = vadd.f32 %v683_v35, %v584_v36  ;;  %v696_v51 = vmax.f32 %v682_v42, 0.0 }
 0x2a5   : > { %v687_v37 = vpop.f32.mrf.mxu0 }
 0x2a6   : > { %v688_v38 = vadd.f32 %v687_v37, %v589_v34  ;;  %v697_v49 = vmax.f32 %v684_v40, 0.0 }
 0x2a7   : > { %v689_v39 = vpop.f32.mrf.mxu0 }
 0x2a8   : > { %v690_v41 = vadd.f32 %v689_v39, %v589_v34  ;;  %v698_v47 = vmax.f32 %v688_v38, 0.0 }
 0x2aa   : > { %v699_v44 = vmax.f32 %v690_v41, 0.0 }
 0x2ac   : > { %738 = vmatprep.subr.mxu1 %v699_v44 }
 0x2ad   : > { %739 = vmatpush1.msra.mxu1 %v698_v47 }
 0x2ae   : > { %740 = vmatprep.subr.mxu1 %v697_v49 }
 0x2af   : > { %741 = vmatpush1.msra.mxu1 %v696_v51 }
 0x2b0   : > { %742 = vmatprep.subr.mxu1 %v695_v52 }
 0x2b1   : > { %743 = vmatpush1.msra.mxu1 %v694_v53 }
 0x2b2   : > { %744 = vmatprep.subr.mxu1 %v693_v54 }
 0x2b3   : > { %745 = vmatpush1.msra.mxu1 %v692_v55 }
 0x2b4   : > { %921 = vmatmul.mubr.msk.f32.vlgmr.msra.gmra.mxu1 %vm451_vm1, %v700_v56 }
 0x374   : > { %v780_v0 = vpop.f32.mrf.mxu1 }
 0x375   : > { %v781_v3 = vadd.f32 %v780_v0, %v710_v1 }
 0x376   : > { %v782_v2 = vpop.f32.mrf.mxu1 }
 0x377   : > { %v783_v4 = vadd.f32 %v782_v2, %v710_v1 }
 0x379   : > { %v787_v7 = vcombine.low %v781_v3, %v783_v4 }
 0x37b   : > { %v794_v8 = vrot.slane %v787_v7, %v793_v6 }
 0x37d   : > { %v801_v9 = vrot.slane %v794_v8, %v793_v6 }
 0x37f   : > { %807 = vst.msk [vmem:[%s277_s11] sm:$0x3] %vm805_vm2, %v801_v9 }
 0x380   : > { %990 = shalt.err (!%p987_p5)
}
 0x381   : > { %s991_s21 = scalar_lea.hbm %s821_s15, 32  ;;  %s995_s27 = scalar_lea.hbm %s1285_s6, 64 }
 0x382   : > { %p992_p7 = scmp.ne.s32.totalorder %s821_s15, %s991_s21  ;;  %p996_p12 = scmp.lt.s32.totalorder %s821_s15, %s1285_s6 }
 0x383   : > { %p997_p13 = scmp.lt.s32.totalorder %s995_s27, %s991_s21 }
 0x384   : > { %p993_p10 = pnand %p992_p7, %p1119_p6 }
 0x385   : > { %p998_p0 = por %p997_p13, %p996_p12 }
 0x386   : > { %p994_p11 = pneg %p993_p10 }
 0x388   : > { %p999_p9 = pnand %p998_p0, %p994_p11 }
 0x38a   : > { %1002 = shalt.err (!%p999_p9)
}
 0x38b   : > { %933 = dma.vmem_to_hbm [thread:$0]  (%p1119_p6), %s824_s12, 32, %s821_s15, %s809_s16  }
 0x38c PF: > { %s835_s10 = sand.u32 1, %s1025_s23   ;;  %p1289_p1 = scmp.ge.s32.totalorder %s1037_s26, 2 }
 0x38d   : > { %s836_s11 = scalar_lea.sflag [#allocation5], %s835_s10 }
 0x38e   : > { %p936_p2 = pnand %p1289_p1, %p1123_p8 }
 0x390   : > { %p937_p3 = pneg %p936_p2 }
 0x392   : > { %1020 = dma.done.wait (%p937_p3), %s836_s11, 32  }
 0x393   : > { %1022 = vsyncadd (%p937_p3), %s836_s11, 4294967264  ;;  %p18_p9 = scmp.ge.s32.totalorder %s1104_s28, 4   ;;  %s1290_s23 = smov %s1029_s24 }
 0x394   : > { %s1291_s24 = smov %s1033_s25  ;;  %s1292_s25 = smov %s1117_s7 }
 0x395   : > { %s1293_s26 = smov %s1104_s28  ;;  %20 = sbr.rel (!%p18_p9) target bundleno = 6 (0x6), region = 110 }
 0x39a   :  { %841 = vsyncpa [#allocation5], 1 }
 0x39b   :  { %843 = vsyncpa [#allocation5 + $0x1], 1 }

</bundles_post_ra>
